<compile_context>
chip_gen: v7x
topology: tpu7x:2x2x1
jax: 0.10.0
libtpu: 0.0.40
codegen_flags: <defaults>
</compile_context>

<pallas_src>
import jax
import jax.numpy as jnp
from jax.experimental import pallas as pl
from jax.experimental.pallas import tpu as pltpu

_LANE = 128


def _round_up(n, m):
    return ((n + m - 1) // m) * m


def _attn_decoder_kernel(idx_ref,
                         coords_ref, lstm_ref,
                         wa_x_ref, wa_h_ref, ba_ref,
                         wc_x_ref, wc_a_ref, bc_ref,
                         wo_ref, bo_ref,
                         out_ref, aw_ref):
    t = pl.program_id(0)
    row = idx_ref[t]                        # decode-step index (SMEM scalar)

    x = coords_ref[row]                     # (B, I)  seq_batch_coords[seq_index]
    h = lstm_ref[row]                       # (B, H)  lstm_out[seq_index]

    # attn(cat(x, h)): concat folded into two MXU matmuls; width padded to 128.
    logits = (jnp.dot(x, wa_x_ref[...], preferred_element_type=jnp.float32)
              + jnp.dot(h, wa_h_ref[...], preferred_element_type=jnp.float32)
              + ba_ref[...])                                        # (B, S_pad)

    # Padded columns carry bias -1e30 -> exp underflows to exactly 0, so the
    # softmax over the real seq columns matches F.softmax exactly.
    m = jnp.max(logits, axis=1, keepdims=True)
    e = jnp.exp(logits - m)
    aw = e / jnp.sum(e, axis=1, keepdims=True)                      # (B, S_pad)
    aw_ref[0] = aw                                                  # lane-dense store

    # attn_applied[b, :] = sum_s aw[b, s] * lstm_out[s, b, :]
    # Pure VPU broadcast multiply-adds over the small static seq axis: no
    # batched dot_general, no transpose; lstm_out stays time-major (S, B, H).
    seq_len = lstm_ref.shape[0]
    applied = aw[:, 0:1] * lstm_ref[0]
    for s in range(1, seq_len):
        applied = applied + aw[:, s:s + 1] * lstm_ref[s]            # (B, H)

    # attn_combine(cat(x, attn_applied)) -> relu -> out (width padded to 128).
    comb = (jnp.dot(x, wc_x_ref[...], preferred_element_type=jnp.float32)
            + jnp.dot(applied, wc_a_ref[...], preferred_element_type=jnp.float32)
            + bc_ref[...])                                          # (B, H)
    comb = jnp.maximum(comb, 0.0)
    out_ref[0] = (jnp.dot(comb, wo_ref[...], preferred_element_type=jnp.float32)
                  + bo_ref[...])                                    # (B, C_pad)


def attn_decoder_lstm_forward_steps(params, seq_batch_coords, lstm_out, seq_indices):
    """Runs the AttnDecoderLSTM forward for every step index in `seq_indices`
    with ONE pallas_call: grid over steps, all inputs VMEM-resident (constant
    index_maps), lane-dense padded outputs streamed back per step.
    Returns (out[T, B, C], attn_weights[T, B, S])."""
    S, B, I = seq_batch_coords.shape
    H = lstm_out.shape[2]
    T = int(seq_indices.shape[0])
    s_pad = params["ba"].shape[1]
    c_pad = params["bo"].shape[1]
    C = params["num_classes"]

    const2 = lambda t, idx: (0, 0)
    const3 = lambda t, idx: (0, 0, 0)

    grid_spec = pltpu.PrefetchScalarGridSpec(
        num_scalar_prefetch=1,
        grid=(T,),
        in_specs=[
            pl.BlockSpec((S, B, I), const3),      # seq_batch_coords (resident)
            pl.BlockSpec((S, B, H), const3),      # lstm_out         (resident)
            pl.BlockSpec((I, s_pad), const2),     # wa_x
            pl.BlockSpec((H, s_pad), const2),     # wa_h
            pl.BlockSpec((1, s_pad), const2),     # ba (padding = -1e30)
            pl.BlockSpec((I, H), const2),         # wc_x
            pl.BlockSpec((H, H), const2),         # wc_a
            pl.BlockSpec((1, H), const2),         # bc
            pl.BlockSpec((H, c_pad), const2),     # wo
            pl.BlockSpec((1, c_pad), const2),     # bo
        ],
        out_specs=[
            pl.BlockSpec((1, B, c_pad), lambda t, idx: (t, 0, 0)),  # output
            pl.BlockSpec((1, B, s_pad), lambda t, idx: (t, 0, 0)),  # attn weights
        ],
    )

    out_pad, aw_pad = pl.pallas_call(
        _attn_decoder_kernel,
        out_shape=(jax.ShapeDtypeStruct((T, B, c_pad), jnp.float32),
                   jax.ShapeDtypeStruct((T, B, s_pad), jnp.float32)),
        grid_spec=grid_spec,
        compiler_params=pltpu.CompilerParams(
            dimension_semantics=("parallel",)),   # steps independent -> megacore OK
    )(seq_indices.astype(jnp.int32),
      seq_batch_coords, lstm_out,
      params["wa_x"], params["wa_h"], params["ba"],
      params["wc_x"], params["wc_a"], params["bc"],
      params["wo"], params["bo"])

    # Slice lane padding back off (outputs were stored lane-dense at 128 wide).
    return out_pad[:, :, :C], aw_pad[:, :, :S]


def attn_decoder_lstm_forward(params, seq_batch_coords, lstm_out, seq_index):
    """Matches AttnDecoderLSTM.forward(seq_batch_coords, lstm_out, seq_index)."""
    idx = jnp.atleast_1d(jnp.asarray(seq_index, jnp.int32))
    out, aw = attn_decoder_lstm_forward_steps(params, seq_batch_coords, lstm_out, idx)
    return out[0], aw[0]


def init_params(key, input_size, hidden_size, max_seq_len, num_classes):
    """nn.Linear-style synthetic init.  Weights stored (in_features, out_features),
    pre-split at the concat boundary, and attn/out widths pre-padded to a
    multiple of 128 lanes (done ONCE here, not per call)."""
    ks = jax.random.split(key, 6)

    def lin(kw, kb, fan_in, fan_out):
        bound = 1.0 / float(fan_in) ** 0.5
        w = jax.random.uniform(kw, (fan_in, fan_out), jnp.float32, -bound, bound)
        b = jax.random.uniform(kb, (1, fan_out), jnp.float32, -bound, bound)
        return w, b

    wa, ba = lin(ks[0], ks[1], input_size + hidden_size, max_seq_len)   # attn
    wc, bc = lin(ks[2], ks[3], input_size + hidden_size, hidden_size)   # attn_combine
    wo, bo = lin(ks[4], ks[5], hidden_size, num_classes)                # out

    s_pad = _round_up(max_seq_len, _LANE)
    c_pad = _round_up(num_classes, _LANE)

    wa = jnp.pad(wa, ((0, 0), (0, s_pad - max_seq_len)))
    # Padded attention logits get a huge negative bias -> softmax mass there is 0.
    ba = jnp.pad(ba, ((0, 0), (0, s_pad - max_seq_len)), constant_values=-1e30)
    wo = jnp.pad(wo, ((0, 0), (0, c_pad - num_classes)))
    bo = jnp.pad(bo, ((0, 0), (0, c_pad - num_classes)))

    return dict(
        wa_x=wa[:input_size], wa_h=wa[input_size:], ba=ba,
        wc_x=wc[:input_size], wc_a=wc[input_size:], bc=bc,
        wo=wo, bo=bo,
        num_classes=num_classes, max_seq_len=max_seq_len,
    )


def reference_forward(params, seq_batch_coords, lstm_out, seq_index):
    """Pure-JAX reference mirroring the PyTorch forward exactly (un-padded weights)."""
    S = lstm_out.shape[0]
    C = params["num_classes"]
    I = params["wa_x"].shape[0]
    wa = jnp.concatenate([params["wa_x"], params["wa_h"]], axis=0)[:, :S]
    ba = params["ba"][:, :S]
    wc = jnp.concatenate([params["wc_x"], params["wc_a"]], axis=0)
    bc = params["bc"]
    wo = params["wo"][:, :C]
    bo = params["bo"][:, :C]

    x_t = seq_batch_coords[seq_index]
    h_t = lstm_out[seq_index]
    cat = jnp.concatenate([x_t, h_t], axis=1)
    aw = jax.nn.softmax(cat @ wa + ba, axis=1)
    applied = jnp.einsum('bs,sbh->bh', aw, lstm_out)
    out = jnp.concatenate([x_t, applied], axis=1) @ wc + bc
    out = jax.nn.relu(out)
    out = out @ wo + bo
    return out, aw


if __name__ == "__main__":
    # Small shapes consistent with the module.
    input_size, hidden_size, max_seq_len, num_classes = 4, 32, 8, 16
    batch = 2
    seq_index = 3

    key = jax.random.PRNGKey(0)
    kp, kc, kl = jax.random.split(key, 3)
    params = init_params(kp, input_size, hidden_size, max_seq_len, num_classes)

    seq_batch_coords = jax.random.normal(kc, (max_seq_len, batch, input_size), jnp.float32)
    lstm_out = jax.random.normal(kl, (max_seq_len, batch, hidden_size), jnp.float32)

    # --- Single-step forward: matches AttnDecoderLSTM.forward exactly. ---
    out, attn_weights = attn_decoder_lstm_forward(params, seq_batch_coords, lstm_out, seq_index)
    out = jax.block_until_ready(out)
    attn_weights = jax.block_until_ready(attn_weights)

    ref_out, ref_aw = reference_forward(params, seq_batch_coords, lstm_out, seq_index)
    assert out.shape == (batch, num_classes)
    assert attn_weights.shape == (batch, max_seq_len)
    assert jnp.allclose(out, ref_out, rtol=1e-5, atol=1e-5)
    assert jnp.allclose(attn_weights, ref_aw, rtol=1e-5, atol=1e-5)

    # --- All decode steps in ONE pallas_call (grid over steps, everything
    #     VMEM-resident across the grid): the launch/DMA-amortized fast path. ---
    all_idx = jnp.arange(max_seq_len, dtype=jnp.int32)
    out_all, aw_all = attn_decoder_lstm_forward_steps(params, seq_batch_coords, lstm_out, all_idx)
    out_all = jax.block_until_ready(out_all)
    aw_all = jax.block_until_ready(aw_all)
    for t in range(max_seq_len):
        r_o, r_a = reference_forward(params, seq_batch_coords, lstm_out, t)
        assert jnp.allclose(out_all[t], r_o, rtol=1e-5, atol=1e-5)
        assert jnp.allclose(aw_all[t], r_a, rtol=1e-5, atol=1e-5)

    print("KERNEL_OK")
</pallas_src>

<mosaic_0001>
module attributes {stable_mosaic.version = 11 : i64} {
  func.func @_attn_decoder_kernel(%arg0: i32, %arg1: memref<1xi32, #tpu.memory_space<smem>>, %arg2: memref<8x2x4xf32, #tpu.memory_space<vmem>>, %arg3: memref<8x2x32xf32, #tpu.memory_space<vmem>>, %arg4: memref<4x128xf32, #tpu.memory_space<vmem>>, %arg5: memref<32x128xf32, #tpu.memory_space<vmem>>, %arg6: memref<1x128xf32, #tpu.memory_space<vmem>>, %arg7: memref<4x32xf32, #tpu.memory_space<vmem>>, %arg8: memref<32x32xf32, #tpu.memory_space<vmem>>, %arg9: memref<1x32xf32, #tpu.memory_space<vmem>>, %arg10: memref<32x128xf32, #tpu.memory_space<vmem>>, %arg11: memref<1x128xf32, #tpu.memory_space<vmem>>, %arg12: memref<1x2x128xf32, #tpu.memory_space<vmem>>, %arg13: memref<1x2x128xf32, #tpu.memory_space<vmem>>) attributes {dimension_semantics = [#tpu.dimension_semantics<parallel>], iteration_bounds = array<i64: 1>, scalar_prefetch = 1 : i64, scratch_operands = 0 : i64, tpu.core_type = #tpu.core_type<tc>, window_params = [{pipeline_mode = #tpu.pipeline_mode<synchronous>, transform_indices = @transform_0, window_bounds = array<i64: 8, 2, 4>}, {pipeline_mode = #tpu.pipeline_mode<synchronous>, transform_indices = @transform_1, window_bounds = array<i64: 8, 2, 32>}, {pipeline_mode = #tpu.pipeline_mode<synchronous>, transform_indices = @transform_2, window_bounds = array<i64: 4, 128>}, {pipeline_mode = #tpu.pipeline_mode<synchronous>, transform_indices = @transform_3, window_bounds = array<i64: 32, 128>}, {pipeline_mode = #tpu.pipeline_mode<synchronous>, transform_indices = @transform_4, window_bounds = array<i64: 1, 128>}, {pipeline_mode = #tpu.pipeline_mode<synchronous>, transform_indices = @transform_5, window_bounds = array<i64: 4, 32>}, {pipeline_mode = #tpu.pipeline_mode<synchronous>, transform_indices = @transform_6, window_bounds = array<i64: 32, 32>}, {pipeline_mode = #tpu.pipeline_mode<synchronous>, transform_indices = @transform_7, window_bounds = array<i64: 1, 32>}, {pipeline_mode = #tpu.pipeline_mode<synchronous>, transform_indices = @transform_8, window_bounds = array<i64: 32, 128>}, {pipeline_mode = #tpu.pipeline_mode<synchronous>, transform_indices = @transform_9, window_bounds = array<i64: 1, 128>}, {transform_indices = @transform_10, window_bounds = array<i64: 1, 2, 128>}, {transform_indices = @transform_11, window_bounds = array<i64: 1, 2, 128>}]} {
    %0 = arith.index_cast %arg0 : i32 to index
    %1 = memref.load %arg1[%0] : memref<1xi32, #tpu.memory_space<smem>>
    %2 = arith.index_cast %1 : i32 to index
    %c0 = arith.constant 0 : index
    %c0_0 = arith.constant 0 : index
    %3 = vector.load %arg2[%2, %c0, %c0_0] : memref<8x2x4xf32, #tpu.memory_space<vmem>>, vector<1x2x4xf32>
    %4 = vector.shape_cast %3 : vector<1x2x4xf32> to vector<2x4xf32>
    %5 = arith.index_cast %1 : i32 to index
    %c0_1 = arith.constant 0 : index
    %c0_2 = arith.constant 0 : index
    %6 = vector.load %arg3[%5, %c0_1, %c0_2] : memref<8x2x32xf32, #tpu.memory_space<vmem>>, vector<1x2x32xf32>
    %7 = vector.shape_cast %6 : vector<1x2x32xf32> to vector<2x32xf32>
    %c0_3 = arith.constant 0 : index
    %c0_4 = arith.constant 0 : index
    %8 = vector.load %arg4[%c0_3, %c0_4] : memref<4x128xf32, #tpu.memory_space<vmem>>, vector<4x128xf32>
    %cst = arith.constant dense<0.000000e+00> : vector<2x128xf32>
    %9 = tpu.matmul %4, %8, %cst {dimension_numbers = #tpu.dot_dimension_numbers<[1], [0], [0], [1], [0, 0, 1, 1], [], []>} : vector<2x4xf32>, vector<4x128xf32>, vector<2x128xf32> -> vector<2x128xf32>
    %c0_5 = arith.constant 0 : index
    %c0_6 = arith.constant 0 : index
    %10 = vector.load %arg5[%c0_5, %c0_6] : memref<32x128xf32, #tpu.memory_space<vmem>>, vector<32x128xf32>
    %cst_7 = arith.constant dense<0.000000e+00> : vector<2x128xf32>
    %11 = tpu.matmul %7, %10, %cst_7 {dimension_numbers = #tpu.dot_dimension_numbers<[1], [0], [0], [1], [0, 0, 1, 1], [], []>} : vector<2x32xf32>, vector<32x128xf32>, vector<2x128xf32> -> vector<2x128xf32>
    %12 = arith.addf %9, %11 : vector<2x128xf32>
    %c0_8 = arith.constant 0 : index
    %c0_9 = arith.constant 0 : index
    %13 = vector.load %arg6[%c0_8, %c0_9] : memref<1x128xf32, #tpu.memory_space<vmem>>, vector<1x128xf32>
    %14 = vector.broadcast %13 : vector<1x128xf32> to vector<2x128xf32>
    %15 = arith.addf %12, %14 : vector<2x128xf32>
    %cst_10 = arith.constant dense<0xFF800000> : vector<2xf32>
    %16 = vector.multi_reduction <maximumf>, %15, %cst_10 [1] : vector<2x128xf32> to vector<2xf32>
    %17 = vector.shape_cast %16 : vector<2xf32> to vector<2x1xf32>
    %18 = vector.broadcast %17 : vector<2x1xf32> to vector<2x128xf32>
    %19 = arith.subf %15, %18 : vector<2x128xf32>
    %20 = math.exp %19 : vector<2x128xf32>
    %cst_11 = arith.constant dense<0.000000e+00> : vector<2xf32>
    %21 = vector.multi_reduction <add>, %20, %cst_11 [1] : vector<2x128xf32> to vector<2xf32>
    %22 = vector.shape_cast %21 : vector<2xf32> to vector<2x1xf32>
    %23 = vector.broadcast %22 : vector<2x1xf32> to vector<2x128xf32>
    %24 = arith.divf %20, %23 : vector<2x128xf32>
    %c0_12 = arith.constant 0 : index
    %c0_13 = arith.constant 0 : index
    %c0_14 = arith.constant 0 : index
    %25 = vector.load %arg13[%c0_12, %c0_13, %c0_14] : memref<1x2x128xf32, #tpu.memory_space<vmem>>, vector<1x2x128xf32>
    %26 = vector.shape_cast %25 : vector<1x2x128xf32> to vector<2x128xf32>
    %27 = vector.shape_cast %24 : vector<2x128xf32> to vector<1x2x128xf32>
    tpu.vector_store %arg13[%c0_12, %c0_13, %c0_14], %27 {strides = array<i32>} : memref<1x2x128xf32, #tpu.memory_space<vmem>>, vector<1x2x128xf32>,
    %28 = vector.extract_strided_slice %24 {offsets = [0, 0], sizes = [2, 1], strides = [1, 1]} : vector<2x128xf32> to vector<2x1xf32>
    %c0_15 = arith.constant 0 : index
    %c0_16 = arith.constant 0 : index
    %c0_17 = arith.constant 0 : index
    %29 = vector.load %arg3[%c0_15, %c0_16, %c0_17] : memref<8x2x32xf32, #tpu.memory_space<vmem>>, vector<1x2x32xf32>
    %30 = vector.shape_cast %29 : vector<1x2x32xf32> to vector<2x32xf32>
    %31 = vector.broadcast %28 : vector<2x1xf32> to vector<2x32xf32>
    %32 = arith.mulf %31, %30 : vector<2x32xf32>
    %33 = vector.extract_strided_slice %24 {offsets = [0, 1], sizes = [2, 1], strides = [1, 1]} : vector<2x128xf32> to vector<2x1xf32>
    %c1 = arith.constant 1 : index
    %c0_18 = arith.constant 0 : index
    %c0_19 = arith.constant 0 : index
    %34 = vector.load %arg3[%c1, %c0_18, %c0_19] : memref<8x2x32xf32, #tpu.memory_space<vmem>>, vector<1x2x32xf32>
    %35 = vector.shape_cast %34 : vector<1x2x32xf32> to vector<2x32xf32>
    %36 = vector.broadcast %33 : vector<2x1xf32> to vector<2x32xf32>
    %37 = arith.mulf %36, %35 : vector<2x32xf32>
    %38 = arith.addf %32, %37 : vector<2x32xf32>
    %39 = vector.extract_strided_slice %24 {offsets = [0, 2], sizes = [2, 1], strides = [1, 1]} : vector<2x128xf32> to vector<2x1xf32>
    %c2 = arith.constant 2 : index
    %c0_20 = arith.constant 0 : index
    %c0_21 = arith.constant 0 : index
    %40 = vector.load %arg3[%c2, %c0_20, %c0_21] : memref<8x2x32xf32, #tpu.memory_space<vmem>>, vector<1x2x32xf32>
    %41 = vector.shape_cast %40 : vector<1x2x32xf32> to vector<2x32xf32>
    %42 = vector.broadcast %39 : vector<2x1xf32> to vector<2x32xf32>
    %43 = arith.mulf %42, %41 : vector<2x32xf32>
    %44 = arith.addf %38, %43 : vector<2x32xf32>
    %45 = vector.extract_strided_slice %24 {offsets = [0, 3], sizes = [2, 1], strides = [1, 1]} : vector<2x128xf32> to vector<2x1xf32>
    %c3 = arith.constant 3 : index
    %c0_22 = arith.constant 0 : index
    %c0_23 = arith.constant 0 : index
    %46 = vector.load %arg3[%c3, %c0_22, %c0_23] : memref<8x2x32xf32, #tpu.memory_space<vmem>>, vector<1x2x32xf32>
    %47 = vector.shape_cast %46 : vector<1x2x32xf32> to vector<2x32xf32>
    %48 = vector.broadcast %45 : vector<2x1xf32> to vector<2x32xf32>
    %49 = arith.mulf %48, %47 : vector<2x32xf32>
    %50 = arith.addf %44, %49 : vector<2x32xf32>
    %51 = vector.extract_strided_slice %24 {offsets = [0, 4], sizes = [2, 1], strides = [1, 1]} : vector<2x128xf32> to vector<2x1xf32>
    %c4 = arith.constant 4 : index
    %c0_24 = arith.constant 0 : index
    %c0_25 = arith.constant 0 : index
    %52 = vector.load %arg3[%c4, %c0_24, %c0_25] : memref<8x2x32xf32, #tpu.memory_space<vmem>>, vector<1x2x32xf32>
    %53 = vector.shape_cast %52 : vector<1x2x32xf32> to vector<2x32xf32>
    %54 = vector.broadcast %51 : vector<2x1xf32> to vector<2x32xf32>
    %55 = arith.mulf %54, %53 : vector<2x32xf32>
    %56 = arith.addf %50, %55 : vector<2x32xf32>
    %57 = vector.extract_strided_slice %24 {offsets = [0, 5], sizes = [2, 1], strides = [1, 1]} : vector<2x128xf32> to vector<2x1xf32>
    %c5 = arith.constant 5 : index
    %c0_26 = arith.constant 0 : index
    %c0_27 = arith.constant 0 : index
    %58 = vector.load %arg3[%c5, %c0_26, %c0_27] : memref<8x2x32xf32, #tpu.memory_space<vmem>>, vector<1x2x32xf32>
    %59 = vector.shape_cast %58 : vector<1x2x32xf32> to vector<2x32xf32>
    %60 = vector.broadcast %57 : vector<2x1xf32> to vector<2x32xf32>
    %61 = arith.mulf %60, %59 : vector<2x32xf32>
    %62 = arith.addf %56, %61 : vector<2x32xf32>
    %63 = vector.extract_strided_slice %24 {offsets = [0, 6], sizes = [2, 1], strides = [1, 1]} : vector<2x128xf32> to vector<2x1xf32>
    %c6 = arith.constant 6 : index
    %c0_28 = arith.constant 0 : index
    %c0_29 = arith.constant 0 : index
    %64 = vector.load %arg3[%c6, %c0_28, %c0_29] : memref<8x2x32xf32, #tpu.memory_space<vmem>>, vector<1x2x32xf32>
    %65 = vector.shape_cast %64 : vector<1x2x32xf32> to vector<2x32xf32>
    %66 = vector.broadcast %63 : vector<2x1xf32> to vector<2x32xf32>
    %67 = arith.mulf %66, %65 : vector<2x32xf32>
    %68 = arith.addf %62, %67 : vector<2x32xf32>
    %69 = vector.extract_strided_slice %24 {offsets = [0, 7], sizes = [2, 1], strides = [1, 1]} : vector<2x128xf32> to vector<2x1xf32>
    %c7 = arith.constant 7 : index
    %c0_30 = arith.constant 0 : index
    %c0_31 = arith.constant 0 : index
    %70 = vector.load %arg3[%c7, %c0_30, %c0_31] : memref<8x2x32xf32, #tpu.memory_space<vmem>>, vector<1x2x32xf32>
    %71 = vector.shape_cast %70 : vector<1x2x32xf32> to vector<2x32xf32>
    %72 = vector.broadcast %69 : vector<2x1xf32> to vector<2x32xf32>
    %73 = arith.mulf %72, %71 : vector<2x32xf32>
    %74 = arith.addf %68, %73 : vector<2x32xf32>
    %c0_32 = arith.constant 0 : index
    %c0_33 = arith.constant 0 : index
    %75 = vector.load %arg7[%c0_32, %c0_33] : memref<4x32xf32, #tpu.memory_space<vmem>>, vector<4x32xf32>
    %cst_34 = arith.constant dense<0.000000e+00> : vector<2x32xf32>
    %76 = tpu.matmul %4, %75, %cst_34 {dimension_numbers = #tpu.dot_dimension_numbers<[1], [0], [0], [1], [0, 0, 1, 1], [], []>} : vector<2x4xf32>, vector<4x32xf32>, vector<2x32xf32> -> vector<2x32xf32>
    %c0_35 = arith.constant 0 : index
    %c0_36 = arith.constant 0 : index
    %77 = vector.load %arg8[%c0_35, %c0_36] : memref<32x32xf32, #tpu.memory_space<vmem>>, vector<32x32xf32>
    %cst_37 = arith.constant dense<0.000000e+00> : vector<2x32xf32>
    %78 = tpu.matmul %74, %77, %cst_37 {dimension_numbers = #tpu.dot_dimension_numbers<[1], [0], [0], [1], [0, 0, 1, 1], [], []>} : vector<2x32xf32>, vector<32x32xf32>, vector<2x32xf32> -> vector<2x32xf32>
    %79 = arith.addf %76, %78 : vector<2x32xf32>
    %c0_38 = arith.constant 0 : index
    %c0_39 = arith.constant 0 : index
    %80 = vector.load %arg9[%c0_38, %c0_39] : memref<1x32xf32, #tpu.memory_space<vmem>>, vector<1x32xf32>
    %81 = vector.broadcast %80 : vector<1x32xf32> to vector<2x32xf32>
    %82 = arith.addf %79, %81 : vector<2x32xf32>
    %cst_40 = arith.constant 0.000000e+00 : f32
    %83 = vector.broadcast %cst_40 : f32 to vector<2x32xf32>
    %84 = arith.maximumf %82, %83 : vector<2x32xf32>
    %c0_41 = arith.constant 0 : index
    %c0_42 = arith.constant 0 : index
    %85 = vector.load %arg10[%c0_41, %c0_42] : memref<32x128xf32, #tpu.memory_space<vmem>>, vector<32x128xf32>
    %cst_43 = arith.constant dense<0.000000e+00> : vector<2x128xf32>
    %86 = tpu.matmul %84, %85, %cst_43 {dimension_numbers = #tpu.dot_dimension_numbers<[1], [0], [0], [1], [0, 0, 1, 1], [], []>} : vector<2x32xf32>, vector<32x128xf32>, vector<2x128xf32> -> vector<2x128xf32>
    %c0_44 = arith.constant 0 : index
    %c0_45 = arith.constant 0 : index
    %87 = vector.load %arg11[%c0_44, %c0_45] : memref<1x128xf32, #tpu.memory_space<vmem>>, vector<1x128xf32>
    %88 = vector.broadcast %87 : vector<1x128xf32> to vector<2x128xf32>
    %89 = arith.addf %86, %88 : vector<2x128xf32>
    %c0_46 = arith.constant 0 : index
    %c0_47 = arith.constant 0 : index
    %c0_48 = arith.constant 0 : index
    %90 = vector.load %arg12[%c0_46, %c0_47, %c0_48] : memref<1x2x128xf32, #tpu.memory_space<vmem>>, vector<1x2x128xf32>
    %91 = vector.shape_cast %90 : vector<1x2x128xf32> to vector<2x128xf32>
    %92 = vector.shape_cast %89 : vector<2x128xf32> to vector<1x2x128xf32>
    tpu.vector_store %arg12[%c0_46, %c0_47, %c0_48], %92 {strides = array<i32>} : memref<1x2x128xf32, #tpu.memory_space<vmem>>, vector<1x2x128xf32>,
    return
  }
  func.func @transform_0(%arg0: i32, %arg1: memref<1xi32, #tpu.memory_space<smem>>) -> (i32, i32, i32) {
    %c0_i32 = arith.constant 0 : i32
    %c0_i32_0 = arith.constant 0 : i32
    %c0_i32_1 = arith.constant 0 : i32
    %c0_i32_2 = arith.constant 0 : i32
    return %c0_i32, %c0_i32_0, %c0_i32_1 : i32, i32, i32
  }
  func.func @transform_1(%arg0: i32, %arg1: memref<1xi32, #tpu.memory_space<smem>>) -> (i32, i32, i32) {
    %c0_i32 = arith.constant 0 : i32
    %c0_i32_0 = arith.constant 0 : i32
    %c0_i32_1 = arith.constant 0 : i32
    %c0_i32_2 = arith.constant 0 : i32
    return %c0_i32, %c0_i32_0, %c0_i32_1 : i32, i32, i32
  }
  func.func @transform_2(%arg0: i32, %arg1: memref<1xi32, #tpu.memory_space<smem>>) -> (i32, i32) {
    %c0_i32 = arith.constant 0 : i32
    %c0_i32_0 = arith.constant 0 : i32
    %c0_i32_1 = arith.constant 0 : i32
    return %c0_i32, %c0_i32_0 : i32, i32
  }
  func.func @transform_3(%arg0: i32, %arg1: memref<1xi32, #tpu.memory_space<smem>>) -> (i32, i32) {
    %c0_i32 = arith.constant 0 : i32
    %c0_i32_0 = arith.constant 0 : i32
    %c0_i32_1 = arith.constant 0 : i32
    return %c0_i32, %c0_i32_0 : i32, i32
  }
  func.func @transform_4(%arg0: i32, %arg1: memref<1xi32, #tpu.memory_space<smem>>) -> (i32, i32) {
    %c0_i32 = arith.constant 0 : i32
    %c0_i32_0 = arith.constant 0 : i32
    %c0_i32_1 = arith.constant 0 : i32
    return %c0_i32, %c0_i32_0 : i32, i32
  }
  func.func @transform_5(%arg0: i32, %arg1: memref<1xi32, #tpu.memory_space<smem>>) -> (i32, i32) {
    %c0_i32 = arith.constant 0 : i32
    %c0_i32_0 = arith.constant 0 : i32
    %c0_i32_1 = arith.constant 0 : i32
    return %c0_i32, %c0_i32_0 : i32, i32
  }
  func.func @transform_6(%arg0: i32, %arg1: memref<1xi32, #tpu.memory_space<smem>>) -> (i32, i32) {
    %c0_i32 = arith.constant 0 : i32
    %c0_i32_0 = arith.constant 0 : i32
    %c0_i32_1 = arith.constant 0 : i32
    return %c0_i32, %c0_i32_0 : i32, i32
  }
  func.func @transform_7(%arg0: i32, %arg1: memref<1xi32, #tpu.memory_space<smem>>) -> (i32, i32) {
    %c0_i32 = arith.constant 0 : i32
    %c0_i32_0 = arith.constant 0 : i32
    %c0_i32_1 = arith.constant 0 : i32
    return %c0_i32, %c0_i32_0 : i32, i32
  }
  func.func @transform_8(%arg0: i32, %arg1: memref<1xi32, #tpu.memory_space<smem>>) -> (i32, i32) {
    %c0_i32 = arith.constant 0 : i32
    %c0_i32_0 = arith.constant 0 : i32
    %c0_i32_1 = arith.constant 0 : i32
    return %c0_i32, %c0_i32_0 : i32, i32
  }
  func.func @transform_9(%arg0: i32, %arg1: memref<1xi32, #tpu.memory_space<smem>>) -> (i32, i32) {
    %c0_i32 = arith.constant 0 : i32
    %c0_i32_0 = arith.constant 0 : i32
    %c0_i32_1 = arith.constant 0 : i32
    return %c0_i32, %c0_i32_0 : i32, i32
  }
  func.func @transform_10(%arg0: i32, %arg1: memref<1xi32, #tpu.memory_space<smem>>) -> (i32, i32, i32) {
    %c0_i32 = arith.constant 0 : i32
    %c0_i32_0 = arith.constant 0 : i32
    %c0_i32_1 = arith.constant 0 : i32
    return %arg0, %c0_i32, %c0_i32_0 : i32, i32, i32
  }
  func.func @transform_11(%arg0: i32, %arg1: memref<1xi32, #tpu.memory_space<smem>>) -> (i32, i32, i32) {
    %c0_i32 = arith.constant 0 : i32
    %c0_i32_0 = arith.constant 0 : i32
    %c0_i32_1 = arith.constant 0 : i32
    return %arg0, %c0_i32, %c0_i32_0 : i32, i32, i32
  }
}

</mosaic_0001>

<bundles_post_ra>
// kernel: tpu_custom_call.1
= control target key start
LH: loop header
LB: loop body
LE: loop exit
PB: predicated region body
PF: predicated region fallthrough
CT: control target
= control target key end

     0   :  { %19 = vsyncpa [#allocation5], 0  ;;  %s1063_s0 = inlined_call_operand.<no memory space> [shape: s32[1], index: 0, kind: input, shape index: {}]   ;;  %s1064_s1 = inlined_call_operand.vmem [shape: f32[8,2,4], index: 1, kind: input, shape index: {}]   ;;  %s1065_s2 = inlined_call_operand.hbm [shape: f32[8,2,32], index: 2, kind: input, shape index: {}]   ;;  %s1066_s3 = inlined_call_operand.vmem [shape: f32[4,128], index: 3, kind: input, shape index: {}]   ;;  %s1067_s4 = inlined_call_operand.vmem [shape: f32[32,128], index: 4, kind: input, shape index: {}]   ;;  %s1068_s5 = inlined_call_operand.vmem [shape: f32[1,128], index: 5, kind: input, shape index: {}]   ;;  %s1069_s6 = inlined_call_operand.vmem [shape: f32[4,32], index: 6, kind: input, shape index: {}]   ;;  %s1070_s7 = inlined_call_operand.hbm [shape: f32[32,32], index: 7, kind: input, shape index: {}]   ;;  %s1071_s8 = inlined_call_operand.vmem [shape: f32[1,32], index: 8, kind: input, shape index: {}]   ;;  %s1072_s9 = inlined_call_operand.hbm [shape: f32[32,128], index: 9, kind: input, shape index: {}]   ;;  %s1073_s10 = inlined_call_operand.vmem [shape: f32[1,128], index: 10, kind: input, shape index: {}]   ;;  %s1074_s11 = inlined_call_operand.hbm [shape: f32[1,2,128], index: 11, kind: output, shape index: {0}]   ;;  %s1075_s12 = inlined_call_operand.hbm [shape: f32[1,2,128], index: 12, kind: output, shape index: {1}]  }
   0x1   :  { %20 = vsyncpa [#allocation8], 0 }
   0x2   :  { %21 = vsyncpa [#allocation6], 0 }
   0x3   :  { %22 = vsyncpa [#allocation12], 0  ;;  %s850_s21 = smov [#allocation7]   ;;  %s732_s25 = scalar_lea.hbm %s1070_s7, 512 }
   0x4   :  { %s50_s22 = sshll.u32 %s850_s21, 4  ;;  %p733_p0 = scmp.ne.s32.totalorder %s1070_s7, %s732_s25  ;;  %s51_s22 = int_to_ptr.vmem [resolvable:$true] %s50_s22 }
   0x5   :  { %p736_p1 = scmp.lt.u32.totalorder %s732_s25, %s1070_s7 }
   0x7   :  { %p738_p2 = pnand %p736_p1, %p733_p0 }
   0x9   :  { %741 = shalt.err (!%p738_p2)
}
   0xa   :  { %s742_s30 = scalar_lea.vmem %s51_s22, 512  ;;  %p747_p4 = scmp.lt.s32.totalorder %s51_s22, %s51_s22 }
   0xb   :  { %p743_p3 = scmp.ne.s32.totalorder %s51_s22, %s742_s30  ;;  %p748_p5 = scmp.lt.s32.totalorder %s742_s30, %s742_s30 }
   0xd   :  { %p749_p6 = por %p748_p5, %p747_p4 }
   0xf   :  { %p750_p7 = pnand %p749_p6, %p743_p3 }
  0x11   :  { %753 = shalt.err (!%p750_p7)
}
  0x12   :  { %s851_s13 = smov 128   ;;  %s852_s14 = smov 8  }
  0x13   :  { %56 = dma.hbm_to_vmem [thread:$0]  %s1070_s7, 512, %s51_s22, [#allocation8], %s851_s13, %s851_s13, %s852_s14  }
  0x14   :  { %s853_s17 = smov [#allocation4]   ;;  %s754_s21 = scalar_lea.hbm %s1065_s2, 256 }
  0x15   :  { %s30_s18 = sshll.u32 %s853_s17, 4  ;;  %p755_p8 = scmp.ne.s32.totalorder %s1065_s2, %s754_s21  ;;  %s31_s18 = int_to_ptr.vmem [resolvable:$true] %s30_s18 }
  0x16   :  { %p758_p9 = scmp.lt.u32.totalorder %s754_s21, %s1065_s2 }
  0x18   :  { %p760_p10 = pnand %p758_p9, %p755_p8 }
  0x1a   :  { %763 = shalt.err (!%p760_p10)
}
  0x1b   :  { %s764_s27 = scalar_lea.vmem %s31_s18, 256  ;;  %p769_p12 = scmp.lt.s32.totalorder %s31_s18, %s31_s18 }
  0x1c   :  { %p765_p11 = scmp.ne.s32.totalorder %s31_s18, %s764_s27  ;;  %p770_p13 = scmp.lt.s32.totalorder %s764_s27, %s764_s27 }
  0x1e   :  { %p771_p0 = por %p770_p13, %p769_p12 }
  0x20   :  { %p772_p1 = pnand %p771_p0, %p765_p11 }
  0x22   :  { %775 = shalt.err (!%p772_p1)
}
  0x23   :  { %s854_s7 = smov 32   ;;  %s855_s22 = smov 2  }
  0x24   :  { %36 = dma.hbm_to_vmem [thread:$0]  %s1065_s2, 256, %s31_s18, [#allocation5], %s854_s7, %s854_s7, %s855_s22  }
  0x25   :  { %s856_s30 = smov [#allocation9]   ;;  %s776_s19 = scalar_lea.hbm %s1072_s9, 512 }
  0x26   :  { %s64_s15 = sshll.u32 %s856_s30, 4  ;;  %p777_p2 = scmp.ne.s32.totalorder %s1072_s9, %s776_s19  ;;  %s65_s15 = int_to_ptr.vmem [resolvable:$true] %s64_s15 }
  0x27   :  { %p780_p3 = scmp.lt.u32.totalorder %s776_s19, %s1072_s9 }
  0x29   :  { %p782_p4 = pnand %p780_p3, %p777_p2 }
  0x2b   :  { %785 = shalt.err (!%p782_p4)
}
  0x2c   :  { %s786_s25 = scalar_lea.vmem %s65_s15, 512  ;;  %p791_p6 = scmp.lt.s32.totalorder %s65_s15, %s65_s15 }
  0x2d   :  { %p787_p5 = scmp.ne.s32.totalorder %s65_s15, %s786_s25  ;;  %p792_p7 = scmp.lt.s32.totalorder %s786_s25, %s786_s25 }
  0x2f   :  { %p793_p8 = por %p792_p7, %p791_p6 }
  0x31   :  { %p794_p9 = pnand %p793_p8, %p787_p5 }
  0x33   :  { %797 = shalt.err (!%p794_p9)
}
  0x34   :  { %70 = dma.hbm_to_vmem [thread:$0]  %s1072_s9, 512, %s65_s15, [#allocation8], %s851_s13, %s851_s13, %s852_s14  }
  0x35   :  { %842 = dma.done.wait [#allocation5], 256  }
  0x36   :  { %843 = vsyncadd [#allocation5], 4294967040 }
  0x37   :  { %844 = dma.done.wait [#allocation8], 1024  }
  0x38   :  { %845 = vsyncadd [#allocation8], 4294966272  ;;  %v857_v0 = vmov 0.0|0.0   ;;  %vm858_vm0 = vmmov 0   ;;  %v859_v1 = vmov 0.0   ;;  %v89_v2 = vld [vmem:[%s1067_s4] sm:$0xff] }
  0x39   :  { %681 = vmatprep.subr.bf16.mxu0 %v857_v0  ;;  %646 = vmatprep.mubr.msk.f32.mxu0 %vm858_vm0, %v859_v1  ;;  %v90_v3 = vld [vmem:[%s1067_s4 + $0x8] sm:$0xff]  ;;  %v91_v4 = vld [vmem:[%s1067_s4 + $0x10] sm:$0xff]  ;;  %v92_v6 = vld [vmem:[%s1067_s4 + $0x18] sm:$0xff]  ;;  %s608_s15 = sshll.u32 %s1063_s0, 1  ;;  %vm93_vm1 = vcmask 261120   ;;  %vm171_vm2 = vcmask 1043456  }
  0x3a   :  { %687 = vmatprep.subr.bf16.mxu1 %v857_v0  ;;  %662 = vmatprep.mubr.msk.f32.mxu1 %vm858_vm0, %v859_v1  ;;  %v682_v5 = vpack.c.bf16 %v90_v3, %v89_v2  ;;  %v685_v7 = vpack.c.bf16 %v92_v6, %v91_v4  ;;  %s86_s16 = scalar_lea.vmem [#allocation4], %s608_s15  ;;  %s84_s20 = scalar_lea.vmem %s1064_s1, %s608_s15  ;;  %v88_v9 = vld [vmem:[%s1066_s3] sm:$0xf]  ;;  %vm167_vm3 = vcmask 31744   ;;  %vm253_vm4 = vcmask 1041408   ;;  %v330_v35 = vld [vmem:[#allocation7] sm:$0xff] }
  0x3b   :  { %v87_v8 = vld [vmem:[%s86_s16] sm:$0x3]  ;;  %v860_v24 = vmov 2   ;;  %v861_v25 = vmov 0   ;;  %v862_v29 = vmov 1   ;;  %v863_v30 = vmov 7  }
  0x3c   :  { %683 = vmatpush3.bf16.msra.mxu0 %v682_v5  ;;  %v1010_v10 = vld [vmem:[%s84_s20] sm:$0x3]  ;;  %721 = vset.pattern.permute.xlu0 %v860_v24  ;;  %v864_v31 = vmov 3   ;;  %v865_v32 = vmov 4   ;;  %v866_v33 = vmov 5   ;;  %v867_v34 = vmov 6  }
  0x3d   :  { %684 = vmatprep.subr.bf16.mxu0 %v857_v0  ;;  %v612_v14 = vld [vmem:[%s1068_s5] ss:$0 sm:$0xff]  ;;  %719 = vset.pattern.permute.xlu1 %v861_v25  ;;  %v331_v36 = vld [vmem:[#allocation7 + $0x8] sm:$0xff]  ;;  %v333_v39 = vld [vmem:[#allocation7 + $0x18] sm:$0xff]  ;;  %s868_s24 = smov [#allocation11]  }
  0x3e   :  { %v688_v37 = vpack.c.bf16 %v331_v36, %v330_v35  ;;  %v332_v38 = vld [vmem:[#allocation7 + $0x10] sm:$0xff]  ;;  %v298_v55 = vld [vmem:[#allocation4 + $0x8] sm:$0x3]  ;;  %v306_v59 = vld [vmem:[#allocation4 + $0xa] sm:$0x3]  ;;  %s590_s25 = sshll.u32 %s868_s24, 4  ;;  %s591_s25 = int_to_ptr.vmem [resolvable:$true] %s590_s25 }
  0x3f   :  { %v691_v40 = vpack.c.bf16 %v333_v39, %v332_v38  ;;  %v329_v41 = vld [vmem:[%s1069_s6] sm:$0xf]  ;;  %v282_v50 = vld [vmem:[#allocation4 + $0x4] sm:$0x3]  ;;  %v290_v53 = vld [vmem:[#allocation4 + $0x6] sm:$0x3]  ;;  %p803_p11 = scmp.lt.s32.totalorder %s591_s25, %s591_s25 }
  0x40   :  { %686 = vmatpush3.bf16.msra.mxu0 %v685_v7  ;;  %689 = vmatpush3.bf16.msra.mxu1 %v688_v37  ;;  %v274_v44 = vld [vmem:[#allocation4 + $0x2] sm:$0x3]  ;;  %v266_v46 = vld [vmem:[#allocation4] sm:$0x3]  ;;  %v314_v61 = vld [vmem:[#allocation4 + $0xc] sm:$0x3] }
  0x41   :  { %649 = vmatprep.subr.mxu0 %v859_v1  ;;  %690 = vmatprep.subr.bf16.mxu1 %v857_v0  ;;  %v322_v5 = vld [vmem:[#allocation4 + $0xe] sm:$0x3]  ;;  %s798_s2 = scalar_lea.vmem %s591_s25, 32 }
  0x42   :  { %p799_p10 = scmp.ne.s32.totalorder %s591_s25, %s798_s2  ;;  %p804_p12 = scmp.lt.s32.totalorder %s798_s2, %s798_s2 }
  0x43   :  { %647 = vmatmul.mubr.msk.f32.vlgmr.msra.gmra.mrb[0].mxu0 %vm93_vm1, %v87_v8 }
  0x44   :  { %650 = vmatpush3.msk.msra.mxu0 %vm171_vm2, %v88_v9  ;;  %651 = vmatprep.mubr.msk.f32.mxu0 %vm858_vm0, %v859_v1  ;;  %p805_p13 = por %p804_p12, %p803_p11 }
  0x45   :  { %665 = vmatprep.subr.mxu0 %v859_v1  ;;  %692 = vmatpush3.bf16.msra.mxu1 %v691_v40 }
  0x46   :  { %693 = vmatprep.subr.bf16.mxu1 %v857_v0  ;;  %p806_p0 = pnand %p805_p13, %p799_p10 }
  0x47   :  { %652 = vmatmul.mubr.msk.f32.vlgmr.msra.gmra.mrb[2].mxu0 %vm167_vm3, %v1010_v10 }
  0x48   :  { %667 = vmatprep.mubr.msk.f32.mxu0 %vm858_vm0, %v859_v1  ;;  %666 = vmatpush3.msk.msra.mxu0 %vm171_vm2, %v329_v41 }
  0x4b   :  { %668 = vmatmul.mubr.msk.f32.vlgmr.msra.gmra.mrb[4].mxu0 %vm167_vm3, %v1010_v10 }
 0x116   :  { %v163_v11 = vpop.f32.mrb[0].mxu0 }
 0x117   :  { %v648_v12 = vpop.f32.mrb[1].mxu0 }
 0x118   :  { %v490_v12 = vld [vmem:[#allocation9 + $0x8] sm:$0xff] }
 0x11a   :  { %v241_v13 = vpop.f32.mrb[2].mxu0 }
 0x11b   :  { %v242_v15 = vadd.f32 %v241_v13, %v163_v11  ;;  %v653_v16 = vpop.f32.mrb[3].mxu0  ;;  %v489_v11 = vld [vmem:[#allocation9] sm:$0xff] }
 0x11c   :  { %v694_v13 = vpack.c.bf16 %v490_v12, %v489_v11  ;;  %v491_v16 = vld [vmem:[#allocation9 + $0x10] sm:$0xff] }
 0x11d   :  { %v252_v17 = vadd.f32 %v612_v14, %v242_v15 }
 0x11e   :  { %v476_v14 = vpop.f32.mrb[4].mxu0 }
 0x11f   :  { %v254_v18 = vsel %vm253_vm4, %v252_v17, -inf  ;;  %v669_v15 = vpop.f32.mrb[5].mxu0 }
 0x120   :  { %255 = vmax.xlane.f32.xlu0 %v254_v18 }
 0x1ad   :  { %v256_v19 = vpop.xlane.xlu0 %255 }
 0x1ae   :  { %v257_v20 = vsub.f32 %v252_v17, %v256_v19  ;;  %v492_v17 = vld [vmem:[#allocation9 + $0x18] sm:$0xff] }
 0x1af   :  { %v697_v18 = vpack.c.bf16 %v492_v17, %v491_v16 }
 0x1b0   :  { %v258_v21 = vmul.f32 1.442695, %v257_v20  ;;  %v616_v20 = vld [vmem:[%s1071_s8] ss:$0 sm:$0xff] }
 0x1b2   :  { %728 = vpow2.f32 %v258_v21 }
 0x1bc   :  { %v729_v22 = vpop.eup %728 }
 0x1bd   :  { %v260_v23 = vsel %vm253_vm4, %v729_v22, 0.0 }
 0x1be   :  { %261 = vadd.xlane.f32.xlu0 %v260_v23 }
 0x24b   :  { %v262_v26 = vpop.xlane.xlu0 %261 }
 0x24c   :  { %730 = vrcp.f32 %v262_v26 }
 0x256   :  { %v731_v27 = vpop.eup %730 }
 0x257   :  { %v264_v28 = vmul.f32 %v731_v27, %v729_v22 }
 0x259   :  { %265 = vst [vmem:[#allocation11] sm:$0x3] %v264_v28  ;;  %284 = vperm.xlu0 %721, %v264_v28   ;;  %269 = vperm.xlu1 %719, %v264_v28  }
 0x25d   :  { %720 = vset.pattern.permute.xlu1 %v862_v29  ;;  %727 = vset.pattern.permute.xlu0 %v863_v30 }
 0x25e   :  { %276 = vperm.xlu1 %720, %v264_v28  }
 0x262   :  { %722 = vset.pattern.permute.xlu1 %v864_v31 }
 0x263   :  { %292 = vperm.xlu1 %722, %v264_v28  }
 0x267   :  { %723 = vset.pattern.permute.xlu1 %v865_v32 }
 0x268   :  { %300 = vperm.xlu1 %723, %v264_v28  }
 0x26c   :  { %724 = vset.pattern.permute.xlu1 %v866_v33 }
 0x26d   :  { %308 = vperm.xlu1 %724, %v264_v28  }
 0x271   :  { %725 = vset.pattern.permute.xlu1 %v867_v34 }
 0x272   :  { %316 = vperm.xlu1 %725, %v264_v28  }
 0x276   :  { %726 = vset.pattern.permute.xlu1 %v863_v30 }
 0x277   :  { %324 = vperm.xlu1 %726, %v264_v28  }
 0x2d8   :  { %v270_v42 = vpop.permute.xlu1 %269  ;;  %v285_v51 = vpop.permute.xlu0 %284 }
 0x2d9   :  { %v272_v48 = vmul.f32 %v270_v42, %v266_v46  ;;  %v287_v54 = vmul.f32 %v285_v51, %v282_v50 }
 0x2dd   :  { %v277_v43 = vpop.permute.xlu1 %276 }
 0x2de   :  { %v279_v47 = vmul.f32 %v277_v43, %v274_v44 }
 0x2e0   :  { %v280_v52 = vadd.f32 %v279_v47, %v272_v48 }
 0x2e2   :  { %v293_v45 = vpop.permute.xlu1 %292  ;;  %v288_v57 = vadd.f32 %v287_v54, %v280_v52 }
 0x2e3   :  { %v295_v58 = vmul.f32 %v293_v45, %v290_v53 }
 0x2e5   :  { %v296_v62 = vadd.f32 %v295_v58, %v288_v57 }
 0x2e7   :  { %v301_v49 = vpop.permute.xlu1 %300 }
 0x2e8   :  { %v303_v60 = vmul.f32 %v301_v49, %v298_v55 }
 0x2ea   :  { %v304_v3 = vadd.f32 %v303_v60, %v296_v62 }
 0x2ec   :  { %v309_v56 = vpop.permute.xlu1 %308 }
 0x2ed   :  { %v311_v63 = vmul.f32 %v309_v56, %v306_v59 }
 0x2ef   :  { %v312_v6 = vadd.f32 %v311_v63, %v304_v3 }
 0x2f1   :  { %v317_v2 = vpop.permute.xlu1 %316 }
 0x2f2   :  { %v319_v4 = vmul.f32 %v317_v2, %v314_v61 }
 0x2f4   :  { %v320_v8 = vadd.f32 %v319_v4, %v312_v6 }
 0x2f6   :  { %v325_v7 = vpop.permute.xlu1 %324 }
 0x2f7   :  { %v327_v9 = vmul.f32 %v325_v7, %v322_v5 }
 0x2f9   :  { %v328_v10 = vadd.f32 %v327_v9, %v320_v8 }
 0x2fb   :  { %663 = vmatmul.mubr.msk.f32.vlgmr.msra.gmra.mrb[0].mxu1 %vm93_vm1, %v328_v10 }
 0x2fc   :  { %678 = vmatprep.mubr.msk.f32.mxu1 %vm858_vm0, %v859_v1  ;;  %695 = vmatpush3.bf16.msra.mxu1 %v694_v13 }
 0x2fd   :  { %696 = vmatprep.subr.bf16.mxu1 %v857_v0 }
 0x300   :  { %698 = vmatpush3.bf16.msra.mxu1 %v697_v18 }
 0x3ce   :  { %v403_v19 = vpop.f32.mrb[0].mxu1 }
 0x3cf   :  { %v477_v21 = vadd.f32 %v476_v14, %v403_v19  ;;  %v664_v22 = vpop.f32.mrb[1].mxu1 }
 0x3d1   :  { %v487_v1 = vadd.f32 %v616_v20, %v477_v21 }
 0x3d3   :  { %v488_v23 = vmax.f32 %v487_v1, 0.0 }
 0x3d5   :  { %679 = vmatmul.mubr.msk.f32.vlgmr.msra.gmra.mrb[2].mxu1 %vm93_vm1, %v488_v23 }
 0x3d6   :  { %809 = shalt.err (!%p806_p0)
}
 0x3d7   :  { %s810_s8 = scalar_lea.hbm %s1075_s12, 32 }
 0x3d8   :  { %p811_p1 = scmp.ne.s32.totalorder %s1075_s12, %s810_s8  ;;  %p814_p2 = scmp.lt.u32.totalorder %s810_s8, %s1075_s12 }
 0x3da   :  { %p816_p3 = pnand %p814_p2, %p811_p1 }
 0x3dc   :  { %819 = shalt.err (!%p816_p3)
}
 0x3dd   :  { %593 = dma.vmem_to_hbm [thread:$0]  %s591_s25, 32, %s1075_s12, [#allocation12]   ;;  %v617_v0 = vld [vmem:[%s1073_s10] ss:$0 sm:$0xff] }
 0x3de   :  { %s869_s30 = smov [#allocation10]  }
 0x3df   :  { %s580_s15 = sshll.u32 %s869_s30, 4  ;;  %s581_s15 = int_to_ptr.vmem [resolvable:$true] %s580_s15 }
 0x3e0   :  { %s820_s16 = scalar_lea.vmem %s581_s15, 32  ;;  %p825_p5 = scmp.lt.s32.totalorder %s581_s15, %s581_s15 }
 0x3e1   :  { %p821_p4 = scmp.ne.s32.totalorder %s581_s15, %s820_s16  ;;  %p826_p6 = scmp.lt.s32.totalorder %s820_s16, %s820_s16 }
 0x3e3   :  { %p827_p7 = por %p826_p6, %p825_p5 }
 0x3e5   :  { %p828_p8 = pnand %p827_p7, %p821_p4 }
 0x4a8   :  { %v569_v24 = vpop.f32.mrb[2].mxu1 }
 0x4a9   :  { %v570_v25 = vadd.f32 %v617_v0, %v569_v24  ;;  %v680_v26 = vpop.f32.mrb[3].mxu1 }
 0x4ab   :  { %573 = vst [vmem:[#allocation10] sm:$0x3] %v570_v25 }
 0x4ac   :  { %831 = shalt.err (!%p828_p8)
}
 0x4ad   :  { %s832_s19 = scalar_lea.hbm %s1074_s11, 32 }
 0x4ae   :  { %p833_p9 = scmp.ne.s32.totalorder %s1074_s11, %s832_s19  ;;  %p836_p10 = scmp.lt.u32.totalorder %s832_s19, %s1074_s11 }
 0x4b0   :  { %p838_p11 = pnand %p836_p10, %p833_p9 }
 0x4b2   :  { %841 = shalt.err (!%p838_p11)
}
 0x4b3   :  { %583 = dma.vmem_to_hbm [thread:$0]  %s581_s15, 32, %s1074_s11, [#allocation6]  }
 0x4b4   :  { %846 = dma.done.wait [#allocation6], 32  }
 0x4b5   :  { %847 = vsyncadd [#allocation6], 4294967264 }
 0x4b6   :  { %848 = dma.done.wait [#allocation12], 32  }
 0x4b7   :  { %849 = vsyncadd [#allocation12], 4294967264 }
 0x4b8   :  { %600 = vsyncpa [#allocation5], 1 }
 0x4b9   :  { %601 = vsyncpa [#allocation8], 1 }
 0x4ba   :  { %602 = vsyncpa [#allocation6], 1 }
 0x4bb   :  { %603 = vsyncpa [#allocation12], 1 }

</bundles_post_ra>
